<compile_context>
chip_gen: v6e
topology: v6e:2x2x1
jax: 0.10.0
libtpu: 0.0.40
codegen_flags: <defaults>
</compile_context>

<pallas_src>
import functools

import jax
import jax.numpy as jnp
from jax.experimental import pallas as pl
from jax.experimental.pallas import tpu as pltpu


# ---------------------------------------------------------------------------
# helpers
# ---------------------------------------------------------------------------
def _cdiv(a: int, b: int) -> int:
    return -(-a // b)


def _round_up(x: int, m: int) -> int:
    return _cdiv(x, m) * m


def _round_down(x: int, m: int) -> int:
    return (x // m) * m


def _sublane_align(dtype) -> int:
    """Sublane packing factor: 8 (4-byte), 16 (2-byte), 32 (1-byte) dtypes."""
    return max(8, 32 // jnp.dtype(dtype).itemsize)


def _device_tuning():
    """(target_block_bytes, vmem_limit_bytes), v7x-aware, safe fallback."""
    try:
        kind = jax.devices()[0].device_kind.lower()
    except Exception:  # pragma: no cover - defensive; never fail tuning
        kind = ""
    if "v7" in kind:
        # v7x: 3.2 TB/s HBM makes the ~0.35us/step tax worth more bytes, but
        # physical VMEM is only 64 MiB -> ~8 MiB blocks, 48 MiB scoped limit.
        return 8 * 1024 * 1024, 48 * 1024 * 1024
    # v5e/v6e: measured elementwise roofline plateaus around 4 MiB f32 blocks;
    # 32 MiB scoped limit (> v5e's 16 MiB default) keeps 2x(x)+2x(out) legal.
    return 4 * 1024 * 1024, 32 * 1024 * 1024


def build_positional_encoding_table(d_model: int, max_len: int = 10,
                                    dtype=jnp.float32) -> jnp.ndarray:
    """Sinusoidal PE table (max_len, d_model), built once in the target dtype."""
    position = jnp.arange(max_len, dtype=jnp.float32)[:, None]          # (L, 1)
    div_term = jnp.exp(jnp.arange(0, d_model, 2, dtype=jnp.float32)
                       * (-jnp.log(10000.0) / d_model))                 # (ceil(D/2),)
    angles = position * div_term                                        # (L, ceil(D/2))
    pe = jnp.zeros((max_len, d_model), dtype=jnp.float32)
    pe = pe.at[:, 0::2].set(jnp.sin(angles))
    pe = pe.at[:, 1::2].set(jnp.cos(angles[:, : d_model // 2]))         # handles odd D
    return pe.astype(dtype)


# ---------------------------------------------------------------------------
# kernel
# ---------------------------------------------------------------------------
def _pos_enc_kernel(x_ref, pe_ref, o_ref, *, groups: int):
    x = x_ref[...]
    pe = pe_ref[...]
    if groups == 1:
        # pe rows either equal x rows (folded, one batch per block) or pe has a
        # single row (unfolded) -> plain / broadcast add.
        o_ref[...] = x + pe
    else:
        # Folded layout, block spans `groups` whole batches: repeat pe along
        # the batch axis via a sublane-tile-aligned reshape (r is a multiple
        # of the packing factor by construction).
        r, c = pe.shape
        o_ref[...] = (x.reshape(groups, r, c) + pe[None, :, :]).reshape(groups * r, c)


# ---------------------------------------------------------------------------
# wrapper
# ---------------------------------------------------------------------------
@jax.jit
def positional_encoding(x: jnp.ndarray, pe: jnp.ndarray) -> jnp.ndarray:
    """x: (B, S, D); pe: (max_len, D). Returns x + pe[:S][None, :, :]."""
    B, S, D = x.shape
    max_len, d_model = pe.shape
    assert S <= max_len, f"seq_len {S} exceeds max_len {max_len}"
    assert D == d_model, "d_model mismatch between x and pe"

    pe_slice = pe[:S, :].astype(x.dtype)   # table already built in x.dtype normally

    N = S * D
    align = _sublane_align(x.dtype)
    target_bytes, vmem_limit = _device_tuning()
    elem = jnp.dtype(x.dtype).itemsize
    target_elems = max(128, target_bytes // elem)

    # Lane-dense 2D view, with an optional small-batch fold so blocks have
    # dense sublanes.  Fold only when it is cleanly tile-aligned.
    if B < align and N % (align * 128) == 0:
        R = align                      # rows per batch after folding (sublane-aligned)
    else:
        R = 1
    L = N // R
    rows, cols = B * R, L
    x2 = x.reshape(rows, cols)
    pe2 = pe_slice.reshape(R, cols)

    # --- tile selection (cdiv grid: tiles need not divide the extents) ------
    max_c = max(128, _round_down(max(128, target_elems // align), 128))
    tile_c = cols if cols <= max_c else max(128, _round_down(max_c, 128))

    row_unit = R if R > 1 else align
    max_r = max(row_unit, target_elems // tile_c)
    tile_r = rows if rows <= max_r else max(row_unit, _round_down(max_r, row_unit))

    # --- guarantee >= 2 grid steps along a "parallel" axis when splittable
    #     (keeps both v7x TensorCores busy; harmless on 1-TC chips) ----------
    n_c, n_r = _cdiv(cols, tile_c), _cdiv(rows, tile_r)
    if n_c * n_r == 1:
        if cols >= 256:
            tile_c = max(128, _round_up(_cdiv(cols, 2), 128))
        elif rows >= 2 * row_unit:
            tile_r = max(row_unit, _round_up(_cdiv(rows, 2), row_unit))
        n_c, n_r = _cdiv(cols, tile_c), _cdiv(rows, tile_r)

    groups = (tile_r // R) if R > 1 else 1

    # Grid: columns OUTER, rows INNER.  pe's block index depends only on the
    # outer axis, so it is NOT re-fetched across the inner (batch) loop; total
    # pe HBM traffic equals one pass over the table.
    grid = (n_c, n_r)

    out2 = pl.pallas_call(
        functools.partial(_pos_enc_kernel, groups=groups),
        out_shape=jax.ShapeDtypeStruct((rows, cols), x.dtype),
        grid_spec=pltpu.PrefetchScalarGridSpec(
            num_scalar_prefetch=0,
            grid=grid,
            in_specs=[
                pl.BlockSpec((tile_r, tile_c), lambda j, i: (i, j)),  # x tile
                pl.BlockSpec((R, tile_c), lambda j, i: (0, j)),       # pe: outer-axis only
            ],
            out_specs=pl.BlockSpec((tile_r, tile_c), lambda j, i: (i, j)),
        ),
        compiler_params=pltpu.CompilerParams(
            dimension_semantics=("parallel", "parallel"),
            vmem_limit_bytes=vmem_limit,
        ),
    )(x2, pe2)

    return out2.reshape(B, S, D)


# ---------------------------------------------------------------------------
# demo / self-check
# ---------------------------------------------------------------------------
if __name__ == "__main__":
    B, S, D = 2, 8, 32
    MAX_LEN = 10

    key = jax.random.PRNGKey(0)
    x = jax.random.normal(key, (B, S, D), dtype=jnp.float32)

    pe = build_positional_encoding_table(D, MAX_LEN, dtype=x.dtype)

    out = positional_encoding(x, pe)
    out = jax.block_until_ready(out)

    # Reference check against the PyTorch forward semantics.
    ref = x + pe[:S, :][None, :, :]
    assert out.shape == (B, S, D)
    assert jnp.allclose(out, ref, atol=1e-6), "mismatch vs reference"

    print("KERNEL_OK")
</pallas_src>

<mosaic_0001>
module attributes {stable_mosaic.version = 11 : i64} {
  func.func @_pos_enc_kernel(%arg0: i32, %arg1: i32, %arg2: memref<2x128xf32, #tpu.memory_space<vmem>>, %arg3: memref<1x128xf32, #tpu.memory_space<vmem>>, %arg4: memref<2x128xf32, #tpu.memory_space<vmem>>) attributes {dimension_semantics = [#tpu.dimension_semantics<parallel>, #tpu.dimension_semantics<parallel>], iteration_bounds = array<i64: 2, 1>, scalar_prefetch = 0 : i64, scratch_operands = 0 : i64, tpu.core_type = #tpu.core_type<tc>, window_params = [{transform_indices = @transform_0, window_bounds = array<i64: 2, 128>}, {transform_indices = @transform_1, window_bounds = array<i64: 1, 128>}, {transform_indices = @transform_2, window_bounds = array<i64: 2, 128>}]} {
    %c0 = arith.constant 0 : index
    %c0_0 = arith.constant 0 : index
    %0 = vector.load %arg2[%c0, %c0_0] : memref<2x128xf32, #tpu.memory_space<vmem>>, vector<2x128xf32>
    %c0_1 = arith.constant 0 : index
    %c0_2 = arith.constant 0 : index
    %1 = vector.load %arg3[%c0_1, %c0_2] : memref<1x128xf32, #tpu.memory_space<vmem>>, vector<1x128xf32>
    %2 = vector.broadcast %1 : vector<1x128xf32> to vector<2x128xf32>
    %3 = arith.addf %0, %2 : vector<2x128xf32>
    %c0_3 = arith.constant 0 : index
    %c0_4 = arith.constant 0 : index
    %4 = vector.load %arg4[%c0_3, %c0_4] : memref<2x128xf32, #tpu.memory_space<vmem>>, vector<2x128xf32>
    tpu.vector_store %arg4[%c0_3, %c0_4], %3 {strides = array<i32>} : memref<2x128xf32, #tpu.memory_space<vmem>>, vector<2x128xf32>,
    return
  }
  func.func @transform_0(%arg0: i32, %arg1: i32) -> (i32, i32) {
    %c0_i32 = arith.constant 0 : i32
    return %arg1, %arg0 : i32, i32
  }
  func.func @transform_1(%arg0: i32, %arg1: i32) -> (i32, i32) {
    %c0_i32 = arith.constant 0 : i32
    %c0_i32_0 = arith.constant 0 : i32
    return %c0_i32, %arg0 : i32, i32
  }
  func.func @transform_2(%arg0: i32, %arg1: i32) -> (i32, i32) {
    %c0_i32 = arith.constant 0 : i32
    return %arg1, %arg0 : i32, i32
  }
}

</mosaic_0001>

<bundles_post_ra>
// kernel: positional_encoding.1
= control target key start
LH: loop header
LB: loop body
LE: loop exit
PB: predicated region body
PF: predicated region fallthrough
CT: control target
= control target key end

     0   :  { %s364_s9 = smov 0   ;;  %s366_s10 = smov 0   ;;  %s383_s0 = inlined_call_operand.vmem [shape: f32[2,256], index: 0, kind: input, shape index: {}]   ;;  %s384_s1 = inlined_call_operand.vmem [shape: f32[1,256], index: 1, kind: input, shape index: {}]   ;;  %s385_s2 = inlined_call_operand.vmem [shape: f32[2,256], index: 2, kind: output, shape index: {}]  }
   0x1   :  { %s345_s11 = smov 0  }
   0x2 LB: > { %s24_s12 = sadd.s32 1, %s343_s10  ;;  %p295_p0 = scmp.ge.s32.totalorder %s347_s11, 1  ;;  %s347_s11 = sphi %s345_s11, %s12_s11   ;;  %s343_s10 = sphi %s366_s10, %s387_s10   ;;  %s339_s9 = sphi %s364_s9, %s386_s9  }
   0x3   : > { %p26_p1 = scmp.ge.s32.totalorder %s24_s12, 2  ;;  %p139_p2 = scmp.lt.s32.totalorder %s347_s11, 3 }
   0x5   : > { %s389_s12 = smov (%p26_p1, %s24_s12), 0  ;;  %p140_p3 = pnand %p295_p0, %p139_p2 }
   0x6   : > { %p172_p4 = scmp.lt.s32.totalorder (!%p140_p3), %s339_s9, 1 }
   0x7   : > { %143 = sbr.rel (%p140_p3) target bundleno = 19 (0x13), region = 28 }
   0xc   : > { %s391_s9 = smov (!%p172_p4, %s339_s9), 1 }
   0xd   : > { %s296_s13 = sshll.u32 %s391_s9, 1  ;;  %s180_s16 = scalar_lea.vmem %s384_s1, %s391_s9 }
   0xe   : > { %s177_s19 = scalar_lea.vmem %s383_s0, %s296_s13  ;;  %v298_v0 = vld [vmem:[%s180_s16] ss:$0 sm:$0xff]  ;;  %s188_s22 = scalar_lea.vmem %s385_s2, %s296_s13 }
   0xf   : > { %v189_v1 = vld [vmem:[%s177_s19] sm:$0x3] }
  0x10   : > { %v197_v2 = vadd.f32 %v298_v0, %v189_v1 }
  0x12   : > { %198 = vst [vmem:[%s188_s22] sm:$0x3] %v197_v2 }
  0x13 PF: > { %s12_s11 = sadd.s32 1, %s347_s11   ;;  %s386_s9 = smov %s343_s10 }
  0x14   : > { %p9_p5 = scmp.ge.s32.totalorder %s12_s11, 4   ;;  %s387_s10 = smov %s389_s12 }
  0x16   :  { %11 = sbr.rel (!%p9_p5) target bundleno = 2 (0x2), region = 61 }

</bundles_post_ra>
